<compile_context>
chip_gen: v6e
topology: v6e:2x2x1
jax: 0.10.0
libtpu: 0.0.40
codegen_flags: <defaults>
</compile_context>

<pallas_src>
import functools

import jax
import jax.numpy as jnp
from jax.experimental import pallas as pl
from jax.experimental.pallas import tpu as pltpu


def _dyrelu_kernel(x_ref, coefs_ref, o_ref, *, k):
    """One (TM, HW) row-tile per grid step.

    x_ref:     (TM, HW)   rows = flattened (b, c) pairs, lanes = flattened spatial
    coefs_ref: (TM, 2k)   slopes a_1..a_k then intercepts b_1..b_k per row
    o_ref:     (TM, HW)
    """
    x = x_ref[...].astype(jnp.float32)          # (TM, HW)
    coefs = coefs_ref[...].astype(jnp.float32)  # (TM, 2k)

    # result = max_j (x * a_j + b_j); k is tiny (2) -> static unroll, pure VPU work.
    result = x * coefs[:, 0:1] + coefs[:, k:k + 1]
    for j in range(1, k):
        result = jnp.maximum(result, x * coefs[:, j:j + 1] + coefs[:, k + j:k + j + 1])

    o_ref[...] = result.astype(o_ref.dtype)


def my_dy_relu(x, relu_coefs, *, k, block_bytes=2 << 20):
    """Pallas equivalent of MyDyRelu(k).forward((x, relu_coefs)).

    x:          (B, C, H, W)
    relu_coefs: (B, C, 2k)
    returns:    (B, C, H, W)
    """
    B, C, H, W = x.shape
    HW = H * W
    rows = B * C

    # Flatten: rows = (b, c) pairs on sublanes, full spatial extent on lanes.
    x2 = x.reshape(rows, HW)
    coefs2 = relu_coefs.reshape(rows, 2 * k)

    # Row-tile size: aim for ~block_bytes per input tile, multiple of 8,
    # clamped to the full row extent for small problems.
    itemsize = jnp.dtype(x.dtype).itemsize
    tm = (block_bytes // max(1, HW * itemsize)) // 8 * 8
    tm = max(8, tm)
    if tm >= rows:
        tm = rows  # full-extent block: any row count is allowed
    grid = (pl.cdiv(rows, tm),)

    kernel = functools.partial(_dyrelu_kernel, k=k)

    out = pl.pallas_call(
        kernel,
        out_shape=jax.ShapeDtypeStruct((rows, HW), x.dtype),
        grid_spec=pltpu.PrefetchScalarGridSpec(
            num_scalar_prefetch=0,
            grid=grid,                                          # fine-grained row-tile loop
            in_specs=[
                pl.BlockSpec((tm, HW), lambda i: (i, 0)),       # x row-tile (lane-dense)
                pl.BlockSpec((tm, 2 * k), lambda i: (i, 0)),    # matching coef rows (tiny)
            ],
            out_specs=pl.BlockSpec((tm, HW), lambda i: (i, 0)),
        ),
        compiler_params=pltpu.CompilerParams(
            dimension_semantics=("parallel",)),                 # both v7x TCs always busy
    )(x2, coefs2)

    return out.reshape(B, C, H, W)


def reference_dy_relu(x, relu_coefs, *, k):
    """Direct JAX port of the PyTorch forward (for verification)."""
    x_perm = jnp.transpose(x, (2, 3, 0, 1))[..., None]              # (H, W, B, C, 1)
    output = x_perm * relu_coefs[:, :, :k] + relu_coefs[:, :, k:]   # (H, W, B, C, k)
    result = jnp.max(output, axis=-1)                               # (H, W, B, C)
    return jnp.transpose(result, (2, 3, 0, 1))                      # (B, C, H, W)


if __name__ == "__main__":
    # Small shapes consistent with the module's forward: x (B, C, H, W), coefs (B, C, 2k).
    B, C, H, W = 2, 4, 16, 16
    k = 2

    key = jax.random.PRNGKey(0)
    kx, kc = jax.random.split(key)

    x = jax.random.normal(kx, (B, C, H, W), dtype=jnp.float32)
    # Coefficients shaped like a DyReLU hyperfunction output: first slope near 1, rest near 0.
    relu_coefs = jax.random.normal(kc, (B, C, 2 * k), dtype=jnp.float32) * 0.5
    relu_coefs = relu_coefs.at[:, :, 0].add(1.0)

    out = my_dy_relu(x, relu_coefs, k=k)
    out = jax.block_until_ready(out)

    ref = reference_dy_relu(x, relu_coefs, k=k)
    assert out.shape == (B, C, H, W)
    assert jnp.allclose(out, ref, atol=1e-5, rtol=1e-5), "mismatch vs reference"
    print("KERNEL_OK")
</pallas_src>

<mosaic_0001>
module attributes {stable_mosaic.version = 11 : i64} {
  func.func @_dyrelu_kernel(%arg0: i32, %arg1: memref<8x256xf32, #tpu.memory_space<vmem>>, %arg2: memref<8x4xf32, #tpu.memory_space<vmem>>, %arg3: memref<8x256xf32, #tpu.memory_space<vmem>>) attributes {dimension_semantics = [#tpu.dimension_semantics<parallel>], iteration_bounds = array<i64: 1>, scalar_prefetch = 0 : i64, scratch_operands = 0 : i64, tpu.core_type = #tpu.core_type<tc>, window_params = [{transform_indices = @transform_0, window_bounds = array<i64: 8, 256>}, {transform_indices = @transform_1, window_bounds = array<i64: 8, 4>}, {transform_indices = @transform_2, window_bounds = array<i64: 8, 256>}]} {
    %c0 = arith.constant 0 : index
    %c0_0 = arith.constant 0 : index
    %0 = vector.load %arg1[%c0, %c0_0] : memref<8x256xf32, #tpu.memory_space<vmem>>, vector<8x256xf32>
    %c0_1 = arith.constant 0 : index
    %c0_2 = arith.constant 0 : index
    %1 = vector.load %arg2[%c0_1, %c0_2] : memref<8x4xf32, #tpu.memory_space<vmem>>, vector<8x4xf32>
    %2 = vector.extract_strided_slice %1 {offsets = [0, 0], sizes = [8, 1], strides = [1, 1]} : vector<8x4xf32> to vector<8x1xf32>
    %3 = vector.broadcast %2 : vector<8x1xf32> to vector<8x256xf32>
    %4 = arith.mulf %0, %3 : vector<8x256xf32>
    %5 = vector.extract_strided_slice %1 {offsets = [0, 2], sizes = [8, 1], strides = [1, 1]} : vector<8x4xf32> to vector<8x1xf32>
    %6 = vector.broadcast %5 : vector<8x1xf32> to vector<8x256xf32>
    %7 = arith.addf %4, %6 : vector<8x256xf32>
    %8 = vector.extract_strided_slice %1 {offsets = [0, 1], sizes = [8, 1], strides = [1, 1]} : vector<8x4xf32> to vector<8x1xf32>
    %9 = vector.broadcast %8 : vector<8x1xf32> to vector<8x256xf32>
    %10 = arith.mulf %0, %9 : vector<8x256xf32>
    %11 = vector.extract_strided_slice %1 {offsets = [0, 3], sizes = [8, 1], strides = [1, 1]} : vector<8x4xf32> to vector<8x1xf32>
    %12 = vector.broadcast %11 : vector<8x1xf32> to vector<8x256xf32>
    %13 = arith.addf %10, %12 : vector<8x256xf32>
    %14 = arith.maximumf %7, %13 : vector<8x256xf32>
    %c0_3 = arith.constant 0 : index
    %c0_4 = arith.constant 0 : index
    %15 = vector.load %arg3[%c0_3, %c0_4] : memref<8x256xf32, #tpu.memory_space<vmem>>, vector<8x256xf32>
    tpu.vector_store %arg3[%c0_3, %c0_4], %14 {strides = array<i32>} : memref<8x256xf32, #tpu.memory_space<vmem>>, vector<8x256xf32>,
    return
  }
  func.func @transform_0(%arg0: i32) -> (i32, i32) {
    %c0_i32 = arith.constant 0 : i32
    %c0_i32_0 = arith.constant 0 : i32
    return %arg0, %c0_i32 : i32, i32
  }
  func.func @transform_1(%arg0: i32) -> (i32, i32) {
    %c0_i32 = arith.constant 0 : i32
    %c0_i32_0 = arith.constant 0 : i32
    return %arg0, %c0_i32 : i32, i32
  }
  func.func @transform_2(%arg0: i32) -> (i32, i32) {
    %c0_i32 = arith.constant 0 : i32
    %c0_i32_0 = arith.constant 0 : i32
    return %arg0, %c0_i32 : i32, i32
  }
}

</mosaic_0001>

<bundles_post_ra>
// kernel: tpu_custom_call.1
= control target key start
LH: loop header
LB: loop body
LE: loop exit
PB: predicated region body
PF: predicated region fallthrough
CT: control target
= control target key end

     0   :  { %7 = vsyncpa [#allocation3], 0  ;;  %s156_s0 = inlined_call_operand.hbm [shape: f32[8,256], index: 0, kind: input, shape index: {}]   ;;  %s157_s1 = inlined_call_operand.vmem [shape: f32[8,4], index: 1, kind: input, shape index: {}]   ;;  %s158_s2 = inlined_call_operand.hbm [shape: f32[8,256], index: 2, kind: output, shape index: {}]  }
   0x1   :  { %8 = vsyncpa [#allocation4], 0  ;;  %s126_s9 = smov [#allocation2]  }
   0x2   :  { %s15_s10 = sshll.u32 %s126_s9, 4  ;;  %s16_s10 = int_to_ptr.vmem [resolvable:$true] %s15_s10 }
   0x3   :  { %s90_s11 = scalar_lea.vmem %s16_s10, 256  ;;  %p95_p1 = scmp.lt.s32.totalorder %s16_s10, %s16_s10 }
   0x4   :  { %p91_p0 = scmp.ne.s32.totalorder %s16_s10, %s90_s11  ;;  %p96_p2 = scmp.lt.s32.totalorder %s90_s11, %s90_s11 }
   0x6   :  { %p97_p3 = por %p96_p2, %p95_p1 }
   0x8   :  { %p98_p4 = pnand %p97_p3, %p91_p0 }
   0xa   :  { %101 = shalt.err (!%p98_p4)
}
   0xb   :  { %18 = dma.hbm_to_vmem [thread:$0]  %s156_s0, 256, %s16_s10, [#allocation3]  }
   0xc   :  { %122 = dma.done.wait [#allocation3], 256  }
   0xd   :  { %123 = vsyncadd [#allocation3], 4294967040  ;;  %v127_v0 = vmov 0   ;;  %v128_v1 = vmov 2   ;;  %v26_v2 = vld [vmem:[%s157_s1] sm:$0xff]  ;;  %v129_v3 = vmov 1  }
   0xe   :  { %77 = vset.pattern.permute.xlu0 %v127_v0  ;;  %79 = vset.pattern.permute.xlu1 %v128_v1  ;;  %v130_v4 = vmov 3   ;;  %v24_v7 = vld [vmem:[#allocation2] sm:$0xff]  ;;  %v25_v8 = vld [vmem:[#allocation2 + $0x8] sm:$0xff]  ;;  %s131_s0 = smov [#allocation5]  }
   0xf   :  { %29 = vperm.xlu0 %77, %v26_v2   ;;  %35 = vperm.xlu1 %79, %v26_v2   ;;  %s62_s1 = sshll.u32 %s131_s0, 4  ;;  %s63_s1 = int_to_ptr.vmem [resolvable:$true] %s62_s1 }
  0x10   :  { %s102_s16 = scalar_lea.vmem %s63_s1, 256  ;;  %p107_p6 = scmp.lt.s32.totalorder %s63_s1, %s63_s1 }
  0x11   :  { %p103_p5 = scmp.ne.s32.totalorder %s63_s1, %s102_s16  ;;  %p108_p7 = scmp.lt.s32.totalorder %s102_s16, %s102_s16 }
  0x13   :  { %78 = vset.pattern.permute.xlu0 %v129_v3  ;;  %80 = vset.pattern.permute.xlu1 %v130_v4  ;;  %p109_p8 = por %p108_p7, %p107_p6 }
  0x14   :  { %41 = vperm.xlu0 %78, %v26_v2   ;;  %47 = vperm.xlu1 %80, %v26_v2  }
  0x15   :  { %p110_p9 = pnand %p109_p8, %p103_p5 }
  0x18   :  { %81 = vset.pattern.permute.xlu0 %v130_v4 }
  0x8a   :  { %v30_v5 = vpop.permute.xlu0 %29  ;;  %v36_v6 = vpop.permute.xlu1 %35 }
  0x8b   :  { %v32_v9 = vmul.f32 %v30_v5, %v24_v7  ;;  %v33_v10 = vmul.f32 %v30_v5, %v25_v8 }
  0x8d   :  { %v38_v15 = vadd.f32 %v36_v6, %v32_v9  ;;  %v39_v16 = vadd.f32 %v36_v6, %v33_v10 }
  0x8f   :  { %v42_v11 = vpop.permute.xlu0 %41  ;;  %v48_v12 = vpop.permute.xlu1 %47 }
  0x90   :  { %v44_v13 = vmul.f32 %v42_v11, %v24_v7  ;;  %v45_v14 = vmul.f32 %v42_v11, %v25_v8 }
  0x92   :  { %v50_v17 = vadd.f32 %v48_v12, %v44_v13  ;;  %v51_v18 = vadd.f32 %v48_v12, %v45_v14 }
  0x94   :  { %v52_v19 = vmax.f32 %v38_v15, %v50_v17  ;;  %v53_v20 = vmax.f32 %v39_v16, %v51_v18 }
  0x96   :  { %54 = vst [vmem:[#allocation5] sm:$0xff] %v52_v19  ;;  %55 = vst [vmem:[#allocation5 + $0x8] sm:$0xff] %v53_v20 }
  0x97   :  { %113 = shalt.err (!%p110_p9)
}
  0x98   :  { %65 = dma.vmem_to_hbm [thread:$0]  %s63_s1, 256, %s158_s2, [#allocation4]  }
  0x99   :  { %124 = dma.done.wait [#allocation4], 256  }
  0x9a   :  { %125 = vsyncadd [#allocation4], 4294967040 }
  0x9b   :  { %69 = vsyncpa [#allocation3], 1 }
  0x9c   :  { %70 = vsyncpa [#allocation4], 1 }

</bundles_post_ra>
